<compile_context>
chip_gen: v5e
topology: v5e:2x2
jax: 0.10.0
libtpu: 0.0.40
codegen_flags: <defaults>
</compile_context>

<pallas_src>
import numpy as np
import jax
import jax.numpy as jnp
from jax.experimental import pallas as pl
from jax.experimental.pallas import tpu as pltpu


_LANES = 512                      # lane-dense slab width (multiple of 128)
_ROW_TILE_DEFAULT = 1024          # (1024, 512) f32 = 2 MiB per input block
_PAD_LOGIT = -1.0e4               # sigmoid(pad)=0, bce(pad, 0)=0 exactly in f32
_MIN_KERNEL_ELEMENTS = 1 << 20    # below this, XLA's fused reduce wins

_CORE_PARALLEL = getattr(pltpu, "CORE_PARALLEL", pltpu.PARALLEL)


def _round_up(x, m):
    return ((x + m - 1) // m) * m


def _device_parallelism():
    """Return (num_outer_partials, outer-axis dimension semantics)."""
    try:
        dev = jax.devices()[0]
        kind = dev.device_kind.lower() if dev.platform == "tpu" else ""
    except Exception:
        kind = ""
    if "7" in kind:                             # v7x-class: 2 TensorCores/chip
        return 2, _CORE_PARALLEL
    if ("v4" in kind) or ("v5p" in kind):       # megacore chips
        return 2, pltpu.PARALLEL
    return 1, pltpu.ARBITRARY                   # v5e / v6e / unknown


def _reference_loss(pred_logits, target, alpha=0.5):
    """Pure-JAX CombinedLoss.forward (also the tiny-tensor fallback)."""
    x = pred_logits.astype(jnp.float32)
    y = target.astype(jnp.float32)
    p = jax.nn.sigmoid(x)
    inter = jnp.sum(p * y)
    dice = 1.0 - (2.0 * inter + 1e-6) / (jnp.sum(p) + jnp.sum(y) + 1e-6)
    bce = jnp.mean(jnp.maximum(x, 0.0) - x * y + jnp.log1p(jnp.exp(-jnp.abs(x))))
    return jnp.float32(alpha) * bce + jnp.float32(1.0 - alpha) * dice


def _make_kernel(full_blocks, n_inner, tm, lanes, needs_guard):
    acc_is_vreg = (tm % 8 == 0)

    def kernel(pred_ref, targ_ref, acc_ref):
        o = pl.program_id(0)
        i = pl.program_id(1)

        @pl.when(i == 0)
        def _init():
            acc_ref[...] = jnp.zeros_like(acc_ref)

        def _compute():
            x = pred_ref[...].astype(jnp.float32)
            y = targ_ref[...].astype(jnp.float32)

            # One tanh feeds both sigmoid and the stable BCE softplus term:
            #   sigmoid(x)       = 0.5 + 0.5 * tanh(x / 2)
            #   log1p(exp(-|x|)) = -log(0.5 + 0.5 * |tanh(x / 2)|)
            t = jnp.tanh(0.5 * x)
            p = 0.5 + 0.5 * t
            bce = jnp.maximum(x, 0.0) - x * y - jnp.log(0.5 + 0.5 * jnp.abs(t))

            def _accumulate(q, v):
                if acc_is_vreg:
                    # Fold tile rows into an aligned (8, lanes) sublane slab:
                    # full-vreg loads/stores, no XLU, no masked RMW.
                    acc_ref[0, q, :, :] += v.reshape(tm // 8, 8, lanes).sum(axis=0)
                else:
                    # Tiny full-extent block (rows < 8): single-row update.
                    acc_ref[0, q, 0:1, :] += v.sum(axis=0, keepdims=True)

            _accumulate(0, p * y)   # intersection
            _accumulate(1, p)       # sum(pred_probs)
            _accumulate(2, y)       # sum(target)
            _accumulate(3, bce)     # sum of BCE-with-logits terms

        if needs_guard:
            # Grid cells past the last full block (outer axis doesn't divide
            # the block count) are skipped; their input index was clamped so
            # the pipeline DMA stays in bounds and their slab stays zero.
            pl.when(o * n_inner + i < full_blocks)(_compute)
        else:
            _compute()

    return kernel


def combined_loss(pred_logits, target, alpha=0.5, *,
                  row_tile=_ROW_TILE_DEFAULT, num_partials=None,
                  min_kernel_elements=_MIN_KERNEL_ELEMENTS, force_kernel=False):
    """Pallas implementation of CombinedLoss.forward. Returns scalar f32."""
    assert pred_logits.shape == target.shape
    n = int(np.prod(pred_logits.shape))
    if n == 0 or ((not force_kernel) and n < min_kernel_elements):
        return _reference_loss(pred_logits, target, alpha)

    L = _LANES
    rows = -(-n // L)

    # Lane-dense 2D view.  Only when numel % 512 != 0 do we have to pad (with
    # exactly-neutral values) to make the (rows, 512) view possible.
    pred_flat = pred_logits.reshape(-1)
    targ_flat = target.reshape(-1)
    lane_pad = rows * L - n
    if lane_pad:
        pred_flat = jnp.pad(pred_flat, (0, lane_pad), constant_values=_PAD_LOGIT)
        targ_flat = jnp.pad(targ_flat, (0, lane_pad), constant_values=0.0)
    p2 = pred_flat.reshape(rows, L)
    t2 = targ_flat.reshape(rows, L)

    # Outer (per-core) axis.
    if num_partials is None:
        P, outer_sem = _device_parallelism()
        if rows < 64:                       # too small to split across cores
            P, outer_sem = 1, pltpu.ARBITRARY
    else:
        P = max(1, int(num_partials))
        outer_sem = pltpu.PARALLEL if P > 1 else pltpu.ARBITRARY

    # Tile rows: multiple of the sublane tile for the narrowest input dtype,
    # capped by row_tile, sized so each core gets roughly equal full blocks.
    item = min(p2.dtype.itemsize, t2.dtype.itemsize)
    min_rows = 8 * max(1, 4 // item)        # 8 (f32), 16 (bf16), 32 (int8)
    cap = max(int(row_tile), min_rows)
    nb = max(P, -(-rows // cap))
    tm = max(min_rows, (rows // nb) // min_rows * min_rows)
    if tm >= rows:
        tm = rows                           # single full-extent block
    full_blocks = rows // tm                # whole blocks handled by the kernel
    tail_rows = rows - full_blocks * tm     # ragged tail handled by XLA below
    n_inner = -(-full_blocks // P)
    needs_guard = (P * n_inner != full_blocks)

    def in_map(o, i):
        blk = o * n_inner + i
        return (jnp.minimum(blk, full_blocks - 1), 0)

    kernel = _make_kernel(full_blocks, n_inner, tm, L, needs_guard)

    kernel_elems = full_blocks * tm * L
    cost = pl.CostEstimate(
        flops=14 * kernel_elems,
        transcendentals=2 * kernel_elems,
        bytes_accessed=kernel_elems * (p2.dtype.itemsize + t2.dtype.itemsize)
        + P * 4 * 8 * L * 4,
    )

    partials = pl.pallas_call(
        kernel,
        out_shape=jax.ShapeDtypeStruct((P, 4, 8, L), jnp.float32),
        grid_spec=pltpu.PrefetchScalarGridSpec(
            num_scalar_prefetch=0,
            grid=(P, n_inner),
            in_specs=[pl.BlockSpec((tm, L), in_map),
                      pl.BlockSpec((tm, L), in_map)],
            out_specs=pl.BlockSpec((1, 4, 8, L), lambda o, i: (o, 0, 0, 0)),
        ),
        compiler_params=pltpu.CompilerParams(
            dimension_semantics=(outer_sem, pltpu.ARBITRARY),
            vmem_limit_bytes=32 * 1024 * 1024,
        ),
        cost_estimate=cost,
    )(p2, t2)

    sums = jnp.sum(partials, axis=(0, 2, 3))
    inter, p_sum, t_sum, bce_sum = sums[0], sums[1], sums[2], sums[3]

    if tail_rows:
        # Ragged row tail (< tm rows): tiny fused XLA epilogue -- avoids both
        # a full padded copy of the inputs and partial kernel blocks.
        xt = p2[full_blocks * tm:, :].astype(jnp.float32)
        yt = t2[full_blocks * tm:, :].astype(jnp.float32)
        pt = jax.nn.sigmoid(xt)
        inter = inter + jnp.sum(pt * yt)
        p_sum = p_sum + jnp.sum(pt)
        t_sum = t_sum + jnp.sum(yt)
        bce_sum = bce_sum + jnp.sum(
            jnp.maximum(xt, 0.0) - xt * yt + jnp.log1p(jnp.exp(-jnp.abs(xt))))

    bce_mean = bce_sum / jnp.float32(n)
    dice_loss = 1.0 - (2.0 * inter + 1e-6) / (p_sum + t_sum + 1e-6)
    a = jnp.float32(alpha)
    return a * bce_mean + (1.0 - a) * dice_loss


if __name__ == "__main__":
    root = jax.random.PRNGKey(0)

    cases = [
        # (shape, dtype, alpha, extra kwargs)
        ((2, 4, 16, 16), jnp.float32, 0.5, {}),                        # single full-extent block
        ((2, 3, 17, 19), jnp.float32, 0.5, {}),                        # numel % 512 != 0 (lane pad)
        ((2, 4, 100, 33), jnp.float32, 0.3, dict(row_tile=16)),        # multi-block + ragged row tail
        ((2, 2, 32, 32), jnp.float32, 0.5, dict(row_tile=8, num_partials=2)),  # clamped/skipped block
        ((2, 4, 64, 64), jnp.bfloat16, 0.5, dict(row_tile=16)),        # bf16 streams through
    ]

    for idx, (shape, dtype, alpha, kw) in enumerate(cases):
        k1, k2 = jax.random.split(jax.random.fold_in(root, idx))
        pred = jax.random.normal(k1, shape, dtype=jnp.float32).astype(dtype)
        targ = (jax.random.uniform(k2, shape) > 0.5).astype(dtype)
        out = jax.block_until_ready(
            combined_loss(pred, targ, alpha=alpha, force_kernel=True, **kw))
        ref = jax.block_until_ready(_reference_loss(pred, targ, alpha=alpha))
        assert np.allclose(np.asarray(out), np.asarray(ref),
                           rtol=1e-5, atol=1e-5), (shape, str(dtype), float(out), float(ref))

    # Tiny-tensor fallback path (pure JAX).
    k1, k2 = jax.random.split(jax.random.fold_in(root, 99))
    pred = jax.random.normal(k1, (2, 4, 16, 16), dtype=jnp.float32)
    targ = (jax.random.uniform(k2, (2, 4, 16, 16)) > 0.5).astype(jnp.float32)
    out = jax.block_until_ready(combined_loss(pred, targ, alpha=0.5))
    ref = jax.block_until_ready(_reference_loss(pred, targ, alpha=0.5))
    assert np.allclose(np.asarray(out), np.asarray(ref), rtol=1e-5, atol=1e-5)

    print("KERNEL_OK")
</pallas_src>

<mosaic_0001>
module attributes {stable_mosaic.version = 11 : i64} {
  func.func @kernel(%arg0: i32, %arg1: i32, %arg2: memref<4x512xf32, #tpu.memory_space<vmem>>, %arg3: memref<4x512xf32, #tpu.memory_space<vmem>>, %arg4: memref<1x4x8x512xf32, #tpu.memory_space<vmem>>) attributes {dimension_semantics = [#tpu.dimension_semantics<arbitrary>, #tpu.dimension_semantics<arbitrary>], iteration_bounds = array<i64: 1, 1>, scalar_prefetch = 0 : i64, scratch_operands = 0 : i64, tpu.core_type = #tpu.core_type<tc>, window_params = [{transform_indices = @transform_0, window_bounds = array<i64: 4, 512>}, {transform_indices = @transform_1, window_bounds = array<i64: 4, 512>}, {transform_indices = @transform_2, window_bounds = array<i64: 1, 4, 8, 512>}]} {
    %c0_i32 = arith.constant 0 : i32
    %0 = arith.cmpi eq, %arg1, %c0_i32 : i32
    %1 = arith.extui %0 : i1 to i32
    %c0_i32_0 = arith.constant 0 : i32
    %2 = arith.cmpi ne, %1, %c0_i32_0 : i32
    scf.if %2 {
      %cst_42 = arith.constant 0.000000e+00 : f32
      %56 = vector.broadcast %cst_42 : f32 to vector<1x4x8x512xf32>
      %c0_43 = arith.constant 0 : index
      %c0_44 = arith.constant 0 : index
      %c0_45 = arith.constant 0 : index
      %c0_46 = arith.constant 0 : index
      %57 = vector.load %arg4[%c0_43, %c0_44, %c0_45, %c0_46] : memref<1x4x8x512xf32, #tpu.memory_space<vmem>>, vector<1x4x8x512xf32>
      tpu.vector_store %arg4[%c0_43, %c0_44, %c0_45, %c0_46], %56 {strides = array<i32>} : memref<1x4x8x512xf32, #tpu.memory_space<vmem>>, vector<1x4x8x512xf32>,
    } else {
    }
    %c0 = arith.constant 0 : index
    %c0_1 = arith.constant 0 : index
    %3 = vector.load %arg2[%c0, %c0_1] : memref<4x512xf32, #tpu.memory_space<vmem>>, vector<4x512xf32>
    %c0_2 = arith.constant 0 : index
    %c0_3 = arith.constant 0 : index
    %4 = vector.load %arg3[%c0_2, %c0_3] : memref<4x512xf32, #tpu.memory_space<vmem>>, vector<4x512xf32>
    %cst = arith.constant 5.000000e-01 : f32
    %5 = vector.broadcast %cst : f32 to vector<4x512xf32>
    %6 = arith.mulf %5, %3 : vector<4x512xf32>
    %7 = math.tanh %6 : vector<4x512xf32>
    %cst_4 = arith.constant 5.000000e-01 : f32
    %8 = vector.broadcast %cst_4 : f32 to vector<4x512xf32>
    %9 = arith.mulf %8, %7 : vector<4x512xf32>
    %cst_5 = arith.constant 5.000000e-01 : f32
    %10 = vector.broadcast %cst_5 : f32 to vector<4x512xf32>
    %11 = arith.addf %10, %9 : vector<4x512xf32>
    %cst_6 = arith.constant 0.000000e+00 : f32
    %12 = vector.broadcast %cst_6 : f32 to vector<4x512xf32>
    %13 = arith.maximumf %3, %12 : vector<4x512xf32>
    %14 = arith.mulf %3, %4 : vector<4x512xf32>
    %15 = arith.subf %13, %14 : vector<4x512xf32>
    %16 = math.absf %7 : vector<4x512xf32>
    %cst_7 = arith.constant 5.000000e-01 : f32
    %17 = vector.broadcast %cst_7 : f32 to vector<4x512xf32>
    %18 = arith.mulf %17, %16 : vector<4x512xf32>
    %cst_8 = arith.constant 5.000000e-01 : f32
    %19 = vector.broadcast %cst_8 : f32 to vector<4x512xf32>
    %20 = arith.addf %19, %18 : vector<4x512xf32>
    %21 = math.log %20 : vector<4x512xf32>
    %22 = arith.subf %15, %21 : vector<4x512xf32>
    %23 = arith.mulf %11, %4 : vector<4x512xf32>
    %c0_9 = arith.constant 0 : index
    %c0_10 = arith.constant 0 : index
    %c0_11 = arith.constant 0 : index
    %c0_12 = arith.constant 0 : index
    %24 = vector.load %arg4[%c0_9, %c0_10, %c0_11, %c0_12] : memref<1x4x8x512xf32, #tpu.memory_space<vmem>>, vector<1x1x1x512xf32>
    %25 = vector.shape_cast %24 : vector<1x1x1x512xf32> to vector<1x512xf32>
    %cst_13 = arith.constant dense<0.000000e+00> : vector<512xf32>
    %26 = vector.multi_reduction <add>, %23, %cst_13 [0] : vector<4x512xf32> to vector<512xf32>
    %27 = vector.shape_cast %26 : vector<512xf32> to vector<1x512xf32>
    %28 = arith.addf %25, %27 : vector<1x512xf32>
    %c0_14 = arith.constant 0 : index
    %c0_15 = arith.constant 0 : index
    %c0_16 = arith.constant 0 : index
    %c0_17 = arith.constant 0 : index
    %29 = vector.load %arg4[%c0_14, %c0_15, %c0_16, %c0_17] : memref<1x4x8x512xf32, #tpu.memory_space<vmem>>, vector<1x1x1x512xf32>
    %30 = vector.shape_cast %29 : vector<1x1x1x512xf32> to vector<1x512xf32>
    %31 = vector.shape_cast %28 : vector<1x512xf32> to vector<1x1x1x512xf32>
    tpu.vector_store %arg4[%c0_14, %c0_15, %c0_16, %c0_17], %31 {strides = array<i32>} : memref<1x4x8x512xf32, #tpu.memory_space<vmem>>, vector<1x1x1x512xf32>,
    %c0_18 = arith.constant 0 : index
    %c1 = arith.constant 1 : index
    %c0_19 = arith.constant 0 : index
    %c0_20 = arith.constant 0 : index
    %32 = vector.load %arg4[%c0_18, %c1, %c0_19, %c0_20] : memref<1x4x8x512xf32, #tpu.memory_space<vmem>>, vector<1x1x1x512xf32>
    %33 = vector.shape_cast %32 : vector<1x1x1x512xf32> to vector<1x512xf32>
    %cst_21 = arith.constant dense<0.000000e+00> : vector<512xf32>
    %34 = vector.multi_reduction <add>, %11, %cst_21 [0] : vector<4x512xf32> to vector<512xf32>
    %35 = vector.shape_cast %34 : vector<512xf32> to vector<1x512xf32>
    %36 = arith.addf %33, %35 : vector<1x512xf32>
    %c0_22 = arith.constant 0 : index
    %c1_23 = arith.constant 1 : index
    %c0_24 = arith.constant 0 : index
    %c0_25 = arith.constant 0 : index
    %37 = vector.load %arg4[%c0_22, %c1_23, %c0_24, %c0_25] : memref<1x4x8x512xf32, #tpu.memory_space<vmem>>, vector<1x1x1x512xf32>
    %38 = vector.shape_cast %37 : vector<1x1x1x512xf32> to vector<1x512xf32>
    %39 = vector.shape_cast %36 : vector<1x512xf32> to vector<1x1x1x512xf32>
    tpu.vector_store %arg4[%c0_22, %c1_23, %c0_24, %c0_25], %39 {strides = array<i32>} : memref<1x4x8x512xf32, #tpu.memory_space<vmem>>, vector<1x1x1x512xf32>,
    %c0_26 = arith.constant 0 : index
    %c2 = arith.constant 2 : index
    %c0_27 = arith.constant 0 : index
    %c0_28 = arith.constant 0 : index
    %40 = vector.load %arg4[%c0_26, %c2, %c0_27, %c0_28] : memref<1x4x8x512xf32, #tpu.memory_space<vmem>>, vector<1x1x1x512xf32>
    %41 = vector.shape_cast %40 : vector<1x1x1x512xf32> to vector<1x512xf32>
    %cst_29 = arith.constant dense<0.000000e+00> : vector<512xf32>
    %42 = vector.multi_reduction <add>, %4, %cst_29 [0] : vector<4x512xf32> to vector<512xf32>
    %43 = vector.shape_cast %42 : vector<512xf32> to vector<1x512xf32>
    %44 = arith.addf %41, %43 : vector<1x512xf32>
    %c0_30 = arith.constant 0 : index
    %c2_31 = arith.constant 2 : index
    %c0_32 = arith.constant 0 : index
    %c0_33 = arith.constant 0 : index
    %45 = vector.load %arg4[%c0_30, %c2_31, %c0_32, %c0_33] : memref<1x4x8x512xf32, #tpu.memory_space<vmem>>, vector<1x1x1x512xf32>
    %46 = vector.shape_cast %45 : vector<1x1x1x512xf32> to vector<1x512xf32>
    %47 = vector.shape_cast %44 : vector<1x512xf32> to vector<1x1x1x512xf32>
    tpu.vector_store %arg4[%c0_30, %c2_31, %c0_32, %c0_33], %47 {strides = array<i32>} : memref<1x4x8x512xf32, #tpu.memory_space<vmem>>, vector<1x1x1x512xf32>,
    %c0_34 = arith.constant 0 : index
    %c3 = arith.constant 3 : index
    %c0_35 = arith.constant 0 : index
    %c0_36 = arith.constant 0 : index
    %48 = vector.load %arg4[%c0_34, %c3, %c0_35, %c0_36] : memref<1x4x8x512xf32, #tpu.memory_space<vmem>>, vector<1x1x1x512xf32>
    %49 = vector.shape_cast %48 : vector<1x1x1x512xf32> to vector<1x512xf32>
    %cst_37 = arith.constant dense<0.000000e+00> : vector<512xf32>
    %50 = vector.multi_reduction <add>, %22, %cst_37 [0] : vector<4x512xf32> to vector<512xf32>
    %51 = vector.shape_cast %50 : vector<512xf32> to vector<1x512xf32>
    %52 = arith.addf %49, %51 : vector<1x512xf32>
    %c0_38 = arith.constant 0 : index
    %c3_39 = arith.constant 3 : index
    %c0_40 = arith.constant 0 : index
    %c0_41 = arith.constant 0 : index
    %53 = vector.load %arg4[%c0_38, %c3_39, %c0_40, %c0_41] : memref<1x4x8x512xf32, #tpu.memory_space<vmem>>, vector<1x1x1x512xf32>
    %54 = vector.shape_cast %53 : vector<1x1x1x512xf32> to vector<1x512xf32>
    %55 = vector.shape_cast %52 : vector<1x512xf32> to vector<1x1x1x512xf32>
    tpu.vector_store %arg4[%c0_38, %c3_39, %c0_40, %c0_41], %55 {strides = array<i32>} : memref<1x4x8x512xf32, #tpu.memory_space<vmem>>, vector<1x1x1x512xf32>,
    return
  }
  func.func @transform_0(%arg0: i32, %arg1: i32) -> (i32, i32) {
    %c1_i32 = arith.constant 1 : i32
    %0 = arith.muli %arg0, %c1_i32 : i32
    %1 = arith.addi %0, %arg1 : i32
    %c0_i32 = arith.constant 0 : i32
    %2 = arith.minsi %1, %c0_i32 : i32
    %c0_i32_0 = arith.constant 0 : i32
    %c0_i32_1 = arith.constant 0 : i32
    return %2, %c0_i32_0 : i32, i32
  }
  func.func @transform_1(%arg0: i32, %arg1: i32) -> (i32, i32) {
    %c1_i32 = arith.constant 1 : i32
    %0 = arith.muli %arg0, %c1_i32 : i32
    %1 = arith.addi %0, %arg1 : i32
    %c0_i32 = arith.constant 0 : i32
    %2 = arith.minsi %1, %c0_i32 : i32
    %c0_i32_0 = arith.constant 0 : i32
    %c0_i32_1 = arith.constant 0 : i32
    return %2, %c0_i32_0 : i32, i32
  }
  func.func @transform_2(%arg0: i32, %arg1: i32) -> (i32, i32, i32, i32) {
    %c0_i32 = arith.constant 0 : i32
    %c0_i32_0 = arith.constant 0 : i32
    %c0_i32_1 = arith.constant 0 : i32
    %c0_i32_2 = arith.constant 0 : i32
    return %arg0, %c0_i32, %c0_i32_0, %c0_i32_1 : i32, i32, i32, i32
  }
}

</mosaic_0001>

<bundles_post_ra>
// kernel: tpu_custom_call.1
= control target key start
LH: loop header
LB: loop body
LE: loop exit
PB: predicated region body
PF: predicated region fallthrough
CT: control target
= control target key end

     0   :  { %7 = vsyncpa [#allocation3], 0  ;;  %s557_s0 = inlined_call_operand.hbm [shape: f32[4,512], index: 0, kind: input, shape index: {}]   ;;  %s558_s1 = inlined_call_operand.hbm [shape: f32[4,512], index: 1, kind: input, shape index: {}]   ;;  %s559_s2 = inlined_call_operand.hbm [shape: f32[1,4,8,512], index: 2, kind: output, shape index: {}]  }
   0x1   :  { %8 = vsyncpa [#allocation6], 0 }
   0x2   :  { %9 = vsyncpa [#allocation4], 0  ;;  %s21_s11 = sshll.u32 %s557_s0, 4  ;;  %s461_s12 = smov [#allocation2]   ;;  %s22_s11 = int_to_ptr.hbm [resolvable:$true] %s21_s11 }
   0x3   :  { %s23_s13 = sshll.u32 %s461_s12, 4  ;;  %s38_s16 = sshll.u32 %s558_s1, 4  ;;  %s24_s13 = int_to_ptr.vmem [resolvable:$true] %s23_s13  ;;  %s39_s16 = int_to_ptr.hbm [resolvable:$true] %s38_s16 }
   0x4   :  { %26 = dma.hbm_to_vmem [thread:$0]  %s22_s11, 256, %s24_s13, [#allocation3]  }
   0x5   :  { %s462_s17 = smov [#allocation5]  }
   0x6   :  { %s40_s18 = sshll.u32 %s462_s17, 4  ;;  %s41_s18 = int_to_ptr.vmem [resolvable:$true] %s40_s18 }
   0x7   :  { %43 = dma.hbm_to_vmem [thread:$0]  %s39_s16, 256, %s41_s18, [#allocation6]  }
   0x8   :  { %455 = dma.done.wait [#allocation3], 256  }
   0x9   :  { %456 = vsyncadd [#allocation3], 4294967040 }
   0xa   :  { %457 = dma.done.wait [#allocation6], 256  }
   0xb   :  { %458 = vsyncadd [#allocation6], 4294967040  ;;  %v488_v0 = vld [vmem:[#allocation2] sm:$0xff]  ;;  %v490_v1 = vld [vmem:[#allocation2 + $0x8] sm:$0xff]  ;;  %v463_v4 = vmov 0.0   ;;  %vm124_vm0 = vcmask 1043456  }
   0xc   :  { %v82_v2 = vmul.f32 0.5, %v488_v0  ;;  %v83_v3 = vmul.f32 0.5, %v490_v1  ;;  %62 = vst [vmem:[#allocation7] sm:$0xff] %v463_v4  ;;  %v494_v9 = vld [vmem:[#allocation5] sm:$0xff]  ;;  %v496_v13 = vld [vmem:[#allocation5 + $0x8] sm:$0xff]  ;;  %v90_v28 = vmax.f32 %v488_v0, 0.0 }
   0xd   :  { %63 = vst [vmem:[#allocation7 + $0x8] sm:$0xff] %v463_v4  ;;  %v92_v33 = vmul.f32 %v494_v9, %v488_v0  ;;  %v91_v38 = vmax.f32 %v490_v1, 0.0  ;;  %v93_v39 = vmul.f32 %v496_v13, %v490_v1  ;;  %vm160_vm1 = vcmask 1040384   ;;  %s464_s0 = smov [#allocation7]   ;;  %s351_s21 = sshll.u32 %s559_s2, 4  ;;  %s352_s21 = int_to_ptr.hbm [resolvable:$true] %s351_s21 }
   0xe   :  { %375 = vtanh.f32 %v82_v2  ;;  %64 = vst [vmem:[#allocation7 + $0x10] sm:$0xff] %v463_v4  ;;  %vm162_vm2 = vcmask 1042434   ;;  %v168_v0 = vlaneseq  ;;  %vm164_vm3 = vcmask 1041408   ;;  %s349_s1 = sshll.u32 %s464_s0, 4  ;;  %s465_s22 = smov 512   ;;  %s350_s1 = int_to_ptr.vmem [resolvable:$true] %s349_s1 }
   0xf   :  { %377 = vtanh.f32 %v83_v3  ;;  %65 = vst [vmem:[#allocation7 + $0x18] sm:$0xff] %v463_v4  ;;  %v94_v47 = vsub.f32 %v90_v28, %v92_v33  ;;  %v512_v52 = vsub.f32 %v91_v38, %v93_v39  ;;  %s466_s23 = smov 32  }
  0x10   :  { %66 = vst [vmem:[#allocation7 + $0x20] sm:$0xff] %v463_v4  ;;  %vm520_vm4 = vcmp.lt.s32.totalorder %v168_v0, 512 }
  0x11   :  { %67 = vst [vmem:[#allocation7 + $0x28] sm:$0xff] %v463_v4 }
  0x12   :  { %68 = vst [vmem:[#allocation7 + $0x30] sm:$0xff] %v463_v4 }
  0x13   :  { %69 = vst [vmem:[#allocation7 + $0x38] sm:$0xff] %v463_v4 }
  0x14   :  { %v376_v5 = vpop.eup %375  ;;  %70 = vst [vmem:[#allocation7 + $0x40] sm:$0xff] %v463_v4 }
  0x15   :  { %v378_v6 = vpop.eup %377  ;;  %v86_v7 = vmul.f32 0.5, %v376_v5  ;;  %v96_v8 = vand.u32 2147483647, %v376_v5  ;;  %71 = vst [vmem:[#allocation7 + $0x48] sm:$0xff] %v463_v4 }
  0x16   :  { %v87_v10 = vmul.f32 0.5, %v378_v6  ;;  %v97_v11 = vand.u32 2147483647, %v378_v6  ;;  %72 = vst [vmem:[#allocation7 + $0x50] sm:$0xff] %v463_v4 }
  0x17   :  { %v88_v12 = vadd.f32 0.5, %v86_v7  ;;  %v98_v15 = vmul.f32 0.5, %v96_v8  ;;  %73 = vst [vmem:[#allocation7 + $0x58] sm:$0xff] %v463_v4 }
  0x18   :  { %v89_v14 = vadd.f32 0.5, %v87_v10  ;;  %v99_v17 = vmul.f32 0.5, %v97_v11  ;;  %74 = vst [vmem:[#allocation7 + $0x60] sm:$0xff] %v463_v4 }
  0x19   :  { %v108_v16 = vmul.f32 %v88_v12, %v494_v9  ;;  %v100_v19 = vadd.f32 0.5, %v98_v15  ;;  %75 = vst [vmem:[#allocation7 + $0x68] sm:$0xff] %v463_v4 }
  0x1a   :  { %v109_v18 = vmul.f32 %v89_v14, %v496_v13  ;;  %v101_v20 = vadd.f32 0.5, %v99_v17  ;;  %76 = vst [vmem:[#allocation7 + $0x70] sm:$0xff] %v463_v4  ;;  %v175_v0 = vld [vmem:[#allocation7 + $0x20] ss:$8 sm:$0xf] }
  0x1b   :  { %113 = vst [vmem:[#allocation1] ss:$2 sm:$0xff] %v108_v16  ;;  %379 = vlog2.f32 %v100_v19 }
  0x1c   :  { %115 = vst [vmem:[#allocation1 + $0x10] ss:$2 sm:$0xff] %v109_v18  ;;  %381 = vlog2.f32 %v101_v20 }
  0x1d   :  { %77 = vst [vmem:[#allocation7 + $0x78] sm:$0xff] %v463_v4 }
  0x21   :  { %v380_v32 = vpop.eup %379 }
  0x22   :  { %v116_v21 = vld.sshfl [vmem:[#allocation1] sm:$0xff pattern:$0x75316420]  ;;  %v117_v22 = vld.sshfl [vmem:[#allocation1 + $0x8] sm:$0xff pattern:$0x75316420]  ;;  %v382_v37 = vpop.eup %381 }
  0x23   :  { %v125_v23 = vsel %vm124_vm0, %v116_v21, 0.0  ;;  %v132_v25 = vsel %vm124_vm0, %v117_v22, 0.0  ;;  %178 = vst [vmem:[#allocation1] ss:$2 sm:$0xff] %v88_v12  ;;  %v103_v44 = vmul.f32 0.6931472, %v380_v32 }
  0x24   :  { %v126_v24 = vrot.slane %v125_v23, 4  ;;  %v133_v26 = vrot.slane %v132_v25, 4  ;;  %v118_v27 = vld.sshfl [vmem:[#allocation1 + $0x10] sm:$0xff pattern:$0x75316420] }
  0x25   :  { %v119_v30 = vld.sshfl [vmem:[#allocation1 + $0x18] sm:$0xff pattern:$0x75316420]  ;;  %v139_v31 = vsel %vm124_vm0, %v118_v27, 0.0  ;;  %v510_v48 = vmul.f32 0.6931472, %v382_v37  ;;  %v106_v15 = vsub.f32 %v94_v47, %v103_v44 }
  0x26   :  { %v127_v29 = vadd.f32 %v126_v24, %v125_v23  ;;  %v134_v34 = vadd.f32 %v133_v26, %v132_v25  ;;  %v140_v35 = vrot.slane %v139_v31, 4  ;;  %v146_v36 = vsel %vm124_vm0, %v119_v30, 0.0  ;;  %180 = vst [vmem:[#allocation1 + $0x10] ss:$2 sm:$0xff] %v89_v14 }
  0x27   :  { %v147_v41 = vrot.slane %v146_v36, 4 }
  0x28   :  { %v128_v40 = vrot.slane %v127_v29, 2  ;;  %v135_v42 = vrot.slane %v134_v34, 2  ;;  %v141_v43 = vadd.f32 %v140_v35, %v139_v31 }
  0x29   :  { %v148_v46 = vadd.f32 %v147_v41, %v146_v36  ;;  %v110_v41 = vld [vmem:[#allocation7] ss:$8 sm:$0xf] }
  0x2a   :  { %v129_v45 = vadd.f32 %v128_v40, %v127_v29  ;;  %v136_v49 = vadd.f32 %v135_v42, %v134_v34  ;;  %v142_v50 = vrot.slane %v141_v43, 2  ;;  %v181_v51 = vld.sshfl [vmem:[#allocation1] sm:$0xff pattern:$0x75316420] }
  0x2b   :  { %v149_v53 = vrot.slane %v148_v46, 2  ;;  %v182_v54 = vld.sshfl [vmem:[#allocation1 + $0x8] sm:$0xff pattern:$0x75316420]  ;;  %v189_v55 = vsel %vm124_vm0, %v181_v51, 0.0 }
  0x2c   :  { %v137_v56 = vrot.slane %v136_v49, 1  ;;  %v143_v57 = vadd.f32 %v142_v50, %v141_v43  ;;  %v190_v58 = vrot.slane %v189_v55, 4  ;;  %v196_v59 = vsel %vm124_vm0, %v182_v54, 0.0  ;;  %235 = vst [vmem:[#allocation1] ss:$2 sm:$0xff] %v494_v9 }
  0x2d   :  { %v130_v60 = vrot.slane %v129_v45, 1  ;;  %v150_v61 = vadd.f32 %v149_v53, %v148_v46  ;;  %v197_v62 = vrot.slane %v196_v59, 4  ;;  %v183_v63 = vld.sshfl [vmem:[#allocation1 + $0x10] sm:$0xff pattern:$0x75316420] }
  0x2e   :  { %v138_v1 = vadd.f32 %v137_v56, %v136_v49  ;;  %v144_v2 = vrot.slane %v143_v57, 1  ;;  %v191_v3 = vadd.f32 %v190_v58, %v189_v55  ;;  %v184_v4 = vld.sshfl [vmem:[#allocation1 + $0x18] sm:$0xff pattern:$0x75316420]  ;;  %v203_v5 = vsel %vm124_vm0, %v183_v63, 0.0 }
  0x2f   :  { %v151_v6 = vrot.slane %v150_v61, 1  ;;  %v198_v7 = vadd.f32 %v197_v62, %v196_v59  ;;  %v204_v8 = vrot.slane %v203_v5, 4  ;;  %v210_v10 = vsel %vm124_vm0, %v184_v4, 0.0  ;;  %237 = vst [vmem:[#allocation1 + $0x10] ss:$2 sm:$0xff] %v496_v13 }
  0x30   :  { %v157_v9 = vrot.slane %v138_v1, 7  ;;  %v145_v11 = vadd.f32 %v144_v2, %v143_v57  ;;  %v192_v12 = vrot.slane %v191_v3, 2  ;;  %v211_v14 = vrot.slane %v210_v10, 4 }
  0x31   :  { %v152_v16 = vadd.f32 %v151_v6, %v150_v61  ;;  %v199_v17 = vrot.slane %v198_v7, 2  ;;  %v205_v18 = vadd.f32 %v204_v8, %v203_v5  ;;  %v131_v19 = vadd.f32 %v130_v60, %v129_v45 }
  0x32   :  { %v158_v20 = vrot.slane %v145_v11, 6  ;;  %v193_v21 = vadd.f32 %v192_v12, %v191_v3  ;;  %v212_v22 = vadd.f32 %v211_v14, %v210_v10  ;;  %v107_v13 = vsub.f32 %v512_v52, %v510_v48 }
  0x33   :  { %v159_v24 = vrot.slane %v152_v16, 5  ;;  %v200_v25 = vadd.f32 %v199_v17, %v198_v7  ;;  %v206_v26 = vrot.slane %v205_v18, 2  ;;  %v238_v27 = vld.sshfl [vmem:[#allocation1] sm:$0xff pattern:$0x75316420]  ;;  %v161_v28 = vsel %vm160_vm1, %v131_v19, %v157_v9 }
  0x34   :  { %v194_v29 = vrot.slane %v193_v21, 1  ;;  %v213_v30 = vrot.slane %v212_v22, 2  ;;  %v239_v31 = vld.sshfl [vmem:[#allocation1 + $0x8] sm:$0xff pattern:$0x75316420]  ;;  %v246_v32 = vsel %vm124_vm0, %v238_v27, 0.0 }
  0x35   :  { %v201_v33 = vrot.slane %v200_v25, 1  ;;  %v207_v34 = vadd.f32 %v206_v26, %v205_v18  ;;  %v247_v35 = vrot.slane %v246_v32, 4  ;;  %v253_v36 = vsel %vm124_vm0, %v239_v31, 0.0  ;;  %292 = vst [vmem:[#allocation1] ss:$2 sm:$0xff] %v106_v15 }
  0x36   :  { %v195_v37 = vadd.f32 %v194_v29, %v193_v21  ;;  %v214_v38 = vadd.f32 %v213_v30, %v212_v22  ;;  %v254_v39 = vrot.slane %v253_v36, 4  ;;  %v240_v40 = vld.sshfl [vmem:[#allocation1 + $0x10] sm:$0xff pattern:$0x75316420]  ;;  %v163_v42 = vsel %vm162_vm2, %v158_v20, %v159_v24 }
  0x37   :  { %v202_v43 = vadd.f32 %v201_v33, %v200_v25  ;;  %v208_v44 = vrot.slane %v207_v34, 1  ;;  %v248_v45 = vadd.f32 %v247_v35, %v246_v32  ;;  %v241_v46 = vld.sshfl [vmem:[#allocation1 + $0x18] sm:$0xff pattern:$0x75316420]  ;;  %v260_v47 = vsel %vm124_vm0, %v240_v40, 0.0 }
  0x38   :  { %v215_v48 = vrot.slane %v214_v38, 1  ;;  %v255_v49 = vadd.f32 %v254_v39, %v253_v36  ;;  %v261_v50 = vrot.slane %v260_v47, 4  ;;  %v267_v51 = vsel %vm124_vm0, %v241_v46, 0.0  ;;  %294 = vst [vmem:[#allocation1 + $0x10] ss:$2 sm:$0xff] %v107_v13 }
  0x39   :  { %v221_v52 = vrot.slane %v202_v43, 7  ;;  %v209_v53 = vadd.f32 %v208_v44, %v207_v34  ;;  %v249_v54 = vrot.slane %v248_v45, 2  ;;  %v268_v55 = vrot.slane %v267_v51, 4 }
  0x3a   :  { %v216_v56 = vadd.f32 %v215_v48, %v214_v38  ;;  %v256_v57 = vrot.slane %v255_v49, 2  ;;  %v262_v58 = vadd.f32 %v261_v50, %v260_v47  ;;  %v165_v59 = vsel %vm164_vm3, %v161_v28, %v163_v42 }
  0x3b   :  { %v222_v60 = vrot.slane %v209_v53, 6  ;;  %v250_v61 = vadd.f32 %v249_v54, %v248_v45  ;;  %v269_v62 = vadd.f32 %v268_v55, %v267_v51  ;;  %v167_v63 = vadd.f32 %v165_v59, %v110_v41  ;;  %v232_v41 = vld [vmem:[#allocation7 + $0x40] ss:$8 sm:$0xf] }
  0x3c   :  { %v223_v1 = vrot.slane %v216_v56, 5  ;;  %v257_v2 = vadd.f32 %v256_v57, %v255_v49  ;;  %v263_v3 = vrot.slane %v262_v58, 2  ;;  %v224_v4 = vsel %vm160_vm1, %v195_v37, %v221_v52  ;;  %v295_v5 = vld.sshfl [vmem:[#allocation1] sm:$0xff pattern:$0x75316420] }
  0x3d   :  { %v251_v6 = vrot.slane %v250_v61, 1  ;;  %v270_v7 = vrot.slane %v269_v62, 2  ;;  %172 = vst.msk [vmem:[#allocation7] ss:$8 sm:$0xf] %vm520_vm4, %v167_v63  ;;  %v303_v8 = vsel %vm124_vm0, %v295_v5, 0.0 }
  0x3e   :  { %v258_v10 = vrot.slane %v257_v2, 1  ;;  %v264_v9 = vadd.f32 %v263_v3, %v262_v58  ;;  %v225_v11 = vsel %vm162_vm2, %v222_v60, %v223_v1  ;;  %v296_v12 = vld.sshfl [vmem:[#allocation1 + $0x8] sm:$0xff pattern:$0x75316420]  ;;  %v304_v14 = vrot.slane %v303_v8, 4 }
  0x3f   :  { %v271_v15 = vadd.f32 %v270_v7, %v269_v62  ;;  %v226_v16 = vsel %vm164_vm3, %v224_v4, %v225_v11  ;;  %v297_v17 = vld.sshfl [vmem:[#allocation1 + $0x10] sm:$0xff pattern:$0x75316420]  ;;  %v298_v18 = vld.sshfl [vmem:[#allocation1 + $0x18] sm:$0xff pattern:$0x75316420]  ;;  %v252_v31 = vadd.f32 %v251_v6, %v250_v61 }
  0x40   :  { %v265_v19 = vrot.slane %v264_v9, 1  ;;  %v228_v20 = vadd.f32 %v226_v16, %v175_v0  ;;  %v259_v21 = vadd.f32 %v258_v10, %v257_v2  ;;  %v305_v22 = vadd.f32 %v304_v14, %v303_v8  ;;  %v289_v63 = vld [vmem:[#allocation7 + $0x60] ss:$8 sm:$0xf] }
  0x41   :  { %v272_v13 = vrot.slane %v271_v15, 1  ;;  %v310_v24 = vsel %vm124_vm0, %v296_v12, 0.0  ;;  %v317_v25 = vsel %vm124_vm0, %v297_v17, 0.0  ;;  %v324_v26 = vsel %vm124_vm0, %v298_v18, 0.0 }
  0x42   :  { %229 = vst.msk [vmem:[#allocation7 + $0x20] ss:$8 sm:$0xf] %vm520_vm4, %v228_v20  ;;  %v266_v27 = vadd.f32 %v265_v19, %v264_v9  ;;  %v278_v28 = vrot.slane %v259_v21, 7  ;;  %v306_v29 = vrot.slane %v305_v22, 2  ;;  %v311_v30 = vrot.slane %v310_v24, 4 }
  0x43   :  { %v273_v32 = vadd.f32 %v272_v13, %v271_v15  ;;  %v318_v33 = vrot.slane %v317_v25, 4  ;;  %v325_v34 = vrot.slane %v324_v26, 4 }
  0x44   :  { %v279_v35 = vrot.slane %v266_v27, 6  ;;  %v312_v36 = vadd.f32 %v311_v30, %v310_v24  ;;  %v281_v38 = vsel %vm160_vm1, %v252_v31, %v278_v28  ;;  %v307_v42 = vadd.f32 %v306_v29, %v305_v22 }
  0x45   :  { %v280_v37 = vrot.slane %v273_v32, 5  ;;  %v319_v39 = vadd.f32 %v318_v33, %v317_v25  ;;  %v326_v40 = vadd.f32 %v325_v34, %v324_v26 }
  0x46   :  { %v313_v43 = vrot.slane %v312_v36, 2  ;;  %v308_v52 = vrot.slane %v307_v42, 1 }
  0x47   :  { %v282_v44 = vsel %vm162_vm2, %v279_v35, %v280_v37  ;;  %v320_v45 = vrot.slane %v319_v39, 2  ;;  %v327_v46 = vrot.slane %v326_v40, 2 }
  0x48   :  { %v283_v47 = vsel %vm164_vm3, %v281_v38, %v282_v44  ;;  %v314_v48 = vadd.f32 %v313_v43, %v312_v36  ;;  %v309_v59 = vadd.f32 %v308_v52, %v307_v42 }
  0x49   :  { %v285_v49 = vadd.f32 %v283_v47, %v232_v41  ;;  %v321_v50 = vadd.f32 %v320_v45, %v319_v39  ;;  %v328_v51 = vadd.f32 %v327_v46, %v326_v40 }
  0x4a   :  { %v315_v53 = vrot.slane %v314_v48, 1 }
  0x4b   :  { %286 = vst.msk [vmem:[#allocation7 + $0x40] ss:$8 sm:$0xf] %vm520_vm4, %v285_v49  ;;  %v322_v54 = vrot.slane %v321_v50, 1  ;;  %v329_v55 = vrot.slane %v328_v51, 1 }
  0x4c   :  { %v316_v56 = vadd.f32 %v315_v53, %v314_v48 }
  0x4d   :  { %v323_v57 = vadd.f32 %v322_v54, %v321_v50  ;;  %v330_v58 = vadd.f32 %v329_v55, %v328_v51 }
  0x4e   :  { %v335_v60 = vrot.slane %v316_v56, 7 }
  0x4f   :  { %v336_v61 = vrot.slane %v323_v57, 6  ;;  %v337_v62 = vrot.slane %v330_v58, 5 }
  0x50   :  { %v338_v0 = vsel %vm160_vm1, %v309_v59, %v335_v60 }
  0x51   :  { %v339_v1 = vsel %vm162_vm2, %v336_v61, %v337_v62 }
  0x52   :  { %v340_v2 = vsel %vm164_vm3, %v338_v0, %v339_v1 }
  0x53   :  { %v342_v3 = vadd.f32 %v340_v2, %v289_v63 }
  0x55   :  { %343 = vst.msk [vmem:[#allocation7 + $0x60] ss:$8 sm:$0xf] %vm520_vm4, %v342_v3 }
  0x56   :  { %357 = dma.vmem_to_hbm [thread:$0]  %s350_s1, 2048, %s352_s21, [#allocation4], %s465_s22, %s465_s22, %s466_s23  }
  0x57   :  { %459 = dma.done.wait [#allocation4], 2048  }
  0x58   :  { %460 = vsyncadd [#allocation4], 4294965248 }
  0x59   :  { %362 = vsyncpa [#allocation3], 1 }
  0x5a   :  { %363 = vsyncpa [#allocation6], 1 }
  0x5b   :  { %364 = vsyncpa [#allocation4], 1 }

</bundles_post_ra>
